<compile_context>
chip_gen: v5e
topology: v5e:2x2
jax: 0.10.0
libtpu: 0.0.40
codegen_flags: <defaults>
</compile_context>

<pallas_src>
import functools

import jax
import jax.numpy as jnp
from jax.experimental import pallas as pl
from jax.experimental.pallas import tpu as pltpu


def _round_up(n, m):
    return ((n + m - 1) // m) * m


def _choose_batch_tile(B):
    # Biggest power-of-two tile (<=512) that evenly divides the batch.
    for tb in (512, 256, 128, 64, 32, 16, 8):
        if B % tb == 0:
            return tb
    return B


def _mlp_dropout_kernel(x_ref, mask_ref, w1_ref, b1_ref, w2_ref, b2_ref,
                        w3_ref, b3_ref, o_ref, *, training: bool,
                        keep_prob: float):
    # fc1 + ReLU  (bf16 MXU operands, f32 accumulate)
    h1 = jnp.dot(x_ref[...].astype(jnp.bfloat16), w1_ref[...],
                 preferred_element_type=jnp.float32)
    h1 = jnp.maximum(h1 + b1_ref[...], 0.0)

    # fc2 + ReLU
    h2 = jnp.dot(h1.astype(jnp.bfloat16), w2_ref[...],
                 preferred_element_type=jnp.float32)
    h2 = jnp.maximum(h2 + b2_ref[...], 0.0)

    # Dropout: keep w.p. keep_prob, scale kept values by 1/keep_prob.
    if training:
        # TODO(synk): use pltpu.prng_seed/prng_random_bits for in-kernel RNG on
        # real hardware; not lowerable in the CPU interpret harness, so the
        # uniform randoms are generated host-side and passed in.
        keep = (mask_ref[...] < keep_prob).astype(jnp.float32)
        h2 = h2 * (keep * (1.0 / keep_prob))

    # fc3 (no activation)
    out = jnp.dot(h2.astype(jnp.bfloat16), w3_ref[...],
                  preferred_element_type=jnp.float32)
    o_ref[...] = (out + b3_ref[...]).astype(o_ref.dtype)


def dropout_mlp(x, params, dropout_key, *, training=True, p=0.5):
    """Forward pass of the Dropout module. x: (B, state_size) float32."""
    w1, b1, w2, b2, w3, b3 = params
    B, S = x.shape
    H1 = w1.shape[1]            # 128
    H2 = w2.shape[1]            # 64
    A = w3.shape[1]             # action_size

    # Pad narrow feature dims up to the 128-lane granule (zero columns/rows).
    H2P = _round_up(H2, 128)
    AP = _round_up(A, 128)
    w2p = jnp.pad(w2, ((0, 0), (0, H2P - H2)))
    b2p = jnp.pad(b2, (0, H2P - H2))
    w3p = jnp.pad(w3, ((0, H2P - H2), (0, AP - A)))
    b3p = jnp.pad(b3, (0, AP - A))

    # Weights as bf16 MXU operands (one-time, wrapper-side cast).
    w1b = w1.astype(jnp.bfloat16)
    w2b = w2p.astype(jnp.bfloat16)
    w3b = w3p.astype(jnp.bfloat16)

    # Host-side uniform randoms for the dropout mask (padded lanes unused —
    # the corresponding h2 columns are identically zero).
    if training:
        mask = jax.random.uniform(dropout_key, (B, H2P), dtype=jnp.float32)
    else:
        mask = jnp.zeros((B, H2P), dtype=jnp.float32)

    TB = _choose_batch_tile(B)
    grid = (B // TB,)
    keep_prob = float(1.0 - p)

    kernel = functools.partial(_mlp_dropout_kernel, training=training,
                               keep_prob=keep_prob)

    flops = 2 * B * (S * H1 + H1 * H2P + H2P * AP)
    bytes_accessed = 4 * B * (S + H2P + AP) + 2 * (S * H1 + H1 * H2P + H2P * AP) \
        + 4 * (H1 + H2P + AP)

    out_padded = pl.pallas_call(
        kernel,
        out_shape=jax.ShapeDtypeStruct((B, AP), jnp.float32),
        grid=grid,
        in_specs=[
            pl.BlockSpec((TB, S), lambda i: (i, 0)),      # x        (tiled)
            pl.BlockSpec((TB, H2P), lambda i: (i, 0)),    # mask     (tiled)
            pl.BlockSpec((S, H1), lambda i: (0, 0)),      # w1  (VMEM-resident)
            pl.BlockSpec((1, H1), lambda i: (0, 0)),      # b1
            pl.BlockSpec((H1, H2P), lambda i: (0, 0)),    # w2
            pl.BlockSpec((1, H2P), lambda i: (0, 0)),     # b2
            pl.BlockSpec((H2P, AP), lambda i: (0, 0)),    # w3
            pl.BlockSpec((1, AP), lambda i: (0, 0)),      # b3
        ],
        out_specs=pl.BlockSpec((TB, AP), lambda i: (i, 0)),
        compiler_params=pltpu.CompilerParams(
            dimension_semantics=("parallel",)),
        cost_estimate=pl.CostEstimate(flops=flops, transcendentals=0,
                                      bytes_accessed=bytes_accessed),
    )(x, mask, w1b, b1.reshape(1, -1), w2b, b2p.reshape(1, -1),
      w3b, b3p.reshape(1, -1))

    return out_padded[:, :A]


def init_params(key, state_size, action_size):
    """Deterministic init mimicking nn.Linear (uniform +-1/sqrt(fan_in))."""
    def linear(k, fan_in, fan_out):
        kw, kb = jax.random.split(k)
        bound = 1.0 / jnp.sqrt(fan_in)
        w = jax.random.uniform(kw, (fan_in, fan_out), jnp.float32, -bound, bound)
        b = jax.random.uniform(kb, (fan_out,), jnp.float32, -bound, bound)
        return w, b

    k1, k2, k3 = jax.random.split(key, 3)
    w1, b1 = linear(k1, state_size, 128)
    w2, b2 = linear(k2, 128, 64)
    w3, b3 = linear(k3, 64, action_size)
    return (w1, b1, w2, b2, w3, b3)


if __name__ == "__main__":
    state_size = 32
    action_size = 4
    batch = 8

    key = jax.random.PRNGKey(0)
    k_params, k_x, k_drop = jax.random.split(key, 3)

    params = init_params(k_params, state_size, action_size)
    x = jax.random.normal(k_x, (batch, state_size), dtype=jnp.float32)

    out = dropout_mlp(x, params, k_drop, training=True, p=0.5)
    out = jax.block_until_ready(out)
    assert out.shape == (batch, action_size)
    assert out.dtype == jnp.float32
    print("KERNEL_OK")
</pallas_src>

<mosaic_0001>
module attributes {stable_mosaic.version = 11 : i64} {
  func.func @_mlp_dropout_kernel(%arg0: i32, %arg1: memref<8x32xf32, #tpu.memory_space<vmem>>, %arg2: memref<8x128xf32, #tpu.memory_space<vmem>>, %arg3: memref<32x128xbf16, #tpu.memory_space<vmem>>, %arg4: memref<1x128xf32, #tpu.memory_space<vmem>>, %arg5: memref<128x128xbf16, #tpu.memory_space<vmem>>, %arg6: memref<1x128xf32, #tpu.memory_space<vmem>>, %arg7: memref<128x128xbf16, #tpu.memory_space<vmem>>, %arg8: memref<1x128xf32, #tpu.memory_space<vmem>>, %arg9: memref<8x128xf32, #tpu.memory_space<vmem>>) attributes {dimension_semantics = [#tpu.dimension_semantics<parallel>], iteration_bounds = array<i64: 1>, scalar_prefetch = 0 : i64, scratch_operands = 0 : i64, tpu.core_type = #tpu.core_type<tc>, window_params = [{transform_indices = @transform_0, window_bounds = array<i64: 8, 32>}, {transform_indices = @transform_1, window_bounds = array<i64: 8, 128>}, {pipeline_mode = #tpu.pipeline_mode<synchronous>, transform_indices = @transform_2, window_bounds = array<i64: 32, 128>}, {pipeline_mode = #tpu.pipeline_mode<synchronous>, transform_indices = @transform_3, window_bounds = array<i64: 1, 128>}, {pipeline_mode = #tpu.pipeline_mode<synchronous>, transform_indices = @transform_4, window_bounds = array<i64: 128, 128>}, {pipeline_mode = #tpu.pipeline_mode<synchronous>, transform_indices = @transform_5, window_bounds = array<i64: 1, 128>}, {pipeline_mode = #tpu.pipeline_mode<synchronous>, transform_indices = @transform_6, window_bounds = array<i64: 128, 128>}, {pipeline_mode = #tpu.pipeline_mode<synchronous>, transform_indices = @transform_7, window_bounds = array<i64: 1, 128>}, {transform_indices = @transform_8, window_bounds = array<i64: 8, 128>}]} {
    %c0 = arith.constant 0 : index
    %c0_0 = arith.constant 0 : index
    %0 = vector.load %arg1[%c0, %c0_0] : memref<8x32xf32, #tpu.memory_space<vmem>>, vector<8x32xf32>
    %1 = arith.truncf %0 : vector<8x32xf32> to vector<8x32xbf16>
    %c0_1 = arith.constant 0 : index
    %c0_2 = arith.constant 0 : index
    %2 = vector.load %arg3[%c0_1, %c0_2] : memref<32x128xbf16, #tpu.memory_space<vmem>>, vector<32x128xbf16>
    %cst = arith.constant dense<0.000000e+00> : vector<8x128xf32>
    %3 = tpu.matmul %1, %2, %cst {dimension_numbers = #tpu.dot_dimension_numbers<[1], [0], [0], [1], [0, 0, 1, 1], [], []>} : vector<8x32xbf16>, vector<32x128xbf16>, vector<8x128xf32> -> vector<8x128xf32>
    %c0_3 = arith.constant 0 : index
    %c0_4 = arith.constant 0 : index
    %4 = vector.load %arg4[%c0_3, %c0_4] : memref<1x128xf32, #tpu.memory_space<vmem>>, vector<1x128xf32>
    %5 = vector.broadcast %4 : vector<1x128xf32> to vector<8x128xf32>
    %6 = arith.addf %3, %5 : vector<8x128xf32>
    %cst_5 = arith.constant 0.000000e+00 : f32
    %7 = vector.broadcast %cst_5 : f32 to vector<8x128xf32>
    %8 = arith.maximumf %6, %7 : vector<8x128xf32>
    %9 = arith.truncf %8 : vector<8x128xf32> to vector<8x128xbf16>
    %c0_6 = arith.constant 0 : index
    %c0_7 = arith.constant 0 : index
    %10 = vector.load %arg5[%c0_6, %c0_7] : memref<128x128xbf16, #tpu.memory_space<vmem>>, vector<128x128xbf16>
    %cst_8 = arith.constant dense<0.000000e+00> : vector<8x128xf32>
    %11 = tpu.matmul %9, %10, %cst_8 {dimension_numbers = #tpu.dot_dimension_numbers<[1], [0], [0], [1], [0, 0, 1, 1], [], []>} : vector<8x128xbf16>, vector<128x128xbf16>, vector<8x128xf32> -> vector<8x128xf32>
    %c0_9 = arith.constant 0 : index
    %c0_10 = arith.constant 0 : index
    %12 = vector.load %arg6[%c0_9, %c0_10] : memref<1x128xf32, #tpu.memory_space<vmem>>, vector<1x128xf32>
    %13 = vector.broadcast %12 : vector<1x128xf32> to vector<8x128xf32>
    %14 = arith.addf %11, %13 : vector<8x128xf32>
    %cst_11 = arith.constant 0.000000e+00 : f32
    %15 = vector.broadcast %cst_11 : f32 to vector<8x128xf32>
    %16 = arith.maximumf %14, %15 : vector<8x128xf32>
    %c0_12 = arith.constant 0 : index
    %c0_13 = arith.constant 0 : index
    %17 = vector.load %arg2[%c0_12, %c0_13] : memref<8x128xf32, #tpu.memory_space<vmem>>, vector<8x128xf32>
    %cst_14 = arith.constant 5.000000e-01 : f32
    %18 = vector.broadcast %cst_14 : f32 to vector<8x128xf32>
    %19 = arith.cmpf olt, %17, %18 : vector<8x128xf32>
    %20 = arith.extui %19 : vector<8x128xi1> to vector<8x128xi32>
    %21 = arith.sitofp %20 : vector<8x128xi32> to vector<8x128xf32>
    %cst_15 = arith.constant 2.000000e+00 : f32
    %22 = vector.broadcast %cst_15 : f32 to vector<8x128xf32>
    %23 = arith.mulf %21, %22 : vector<8x128xf32>
    %24 = arith.mulf %16, %23 : vector<8x128xf32>
    %25 = arith.truncf %24 : vector<8x128xf32> to vector<8x128xbf16>
    %c0_16 = arith.constant 0 : index
    %c0_17 = arith.constant 0 : index
    %26 = vector.load %arg7[%c0_16, %c0_17] : memref<128x128xbf16, #tpu.memory_space<vmem>>, vector<128x128xbf16>
    %cst_18 = arith.constant dense<0.000000e+00> : vector<8x128xf32>
    %27 = tpu.matmul %25, %26, %cst_18 {dimension_numbers = #tpu.dot_dimension_numbers<[1], [0], [0], [1], [0, 0, 1, 1], [], []>} : vector<8x128xbf16>, vector<128x128xbf16>, vector<8x128xf32> -> vector<8x128xf32>
    %c0_19 = arith.constant 0 : index
    %c0_20 = arith.constant 0 : index
    %28 = vector.load %arg8[%c0_19, %c0_20] : memref<1x128xf32, #tpu.memory_space<vmem>>, vector<1x128xf32>
    %29 = vector.broadcast %28 : vector<1x128xf32> to vector<8x128xf32>
    %30 = arith.addf %27, %29 : vector<8x128xf32>
    %c0_21 = arith.constant 0 : index
    %c0_22 = arith.constant 0 : index
    %31 = vector.load %arg9[%c0_21, %c0_22] : memref<8x128xf32, #tpu.memory_space<vmem>>, vector<8x128xf32>
    tpu.vector_store %arg9[%c0_21, %c0_22], %30 {strides = array<i32>} : memref<8x128xf32, #tpu.memory_space<vmem>>, vector<8x128xf32>,
    return
  }
  func.func @transform_0(%arg0: i32) -> (i32, i32) {
    %c0_i32 = arith.constant 0 : i32
    %c0_i32_0 = arith.constant 0 : i32
    return %arg0, %c0_i32 : i32, i32
  }
  func.func @transform_1(%arg0: i32) -> (i32, i32) {
    %c0_i32 = arith.constant 0 : i32
    %c0_i32_0 = arith.constant 0 : i32
    return %arg0, %c0_i32 : i32, i32
  }
  func.func @transform_2(%arg0: i32) -> (i32, i32) {
    %c0_i32 = arith.constant 0 : i32
    %c0_i32_0 = arith.constant 0 : i32
    %c0_i32_1 = arith.constant 0 : i32
    return %c0_i32, %c0_i32_0 : i32, i32
  }
  func.func @transform_3(%arg0: i32) -> (i32, i32) {
    %c0_i32 = arith.constant 0 : i32
    %c0_i32_0 = arith.constant 0 : i32
    %c0_i32_1 = arith.constant 0 : i32
    return %c0_i32, %c0_i32_0 : i32, i32
  }
  func.func @transform_4(%arg0: i32) -> (i32, i32) {
    %c0_i32 = arith.constant 0 : i32
    %c0_i32_0 = arith.constant 0 : i32
    %c0_i32_1 = arith.constant 0 : i32
    return %c0_i32, %c0_i32_0 : i32, i32
  }
  func.func @transform_5(%arg0: i32) -> (i32, i32) {
    %c0_i32 = arith.constant 0 : i32
    %c0_i32_0 = arith.constant 0 : i32
    %c0_i32_1 = arith.constant 0 : i32
    return %c0_i32, %c0_i32_0 : i32, i32
  }
  func.func @transform_6(%arg0: i32) -> (i32, i32) {
    %c0_i32 = arith.constant 0 : i32
    %c0_i32_0 = arith.constant 0 : i32
    %c0_i32_1 = arith.constant 0 : i32
    return %c0_i32, %c0_i32_0 : i32, i32
  }
  func.func @transform_7(%arg0: i32) -> (i32, i32) {
    %c0_i32 = arith.constant 0 : i32
    %c0_i32_0 = arith.constant 0 : i32
    %c0_i32_1 = arith.constant 0 : i32
    return %c0_i32, %c0_i32_0 : i32, i32
  }
  func.func @transform_8(%arg0: i32) -> (i32, i32) {
    %c0_i32 = arith.constant 0 : i32
    %c0_i32_0 = arith.constant 0 : i32
    return %arg0, %c0_i32 : i32, i32
  }
}

</mosaic_0001>

<bundles_post_ra>
// kernel: tpu_custom_call.1
= control target key start
LH: loop header
LB: loop body
LE: loop exit
PB: predicated region body
PF: predicated region fallthrough
CT: control target
= control target key end

     0   :  { %13 = vsyncpa [#allocation3], 0  ;;  %s673_s0 = inlined_call_operand.hbm [shape: f32[8,32], index: 0, kind: input, shape index: {}]   ;;  %s674_s1 = inlined_call_operand.hbm [shape: f32[8,128], index: 1, kind: input, shape index: {}]   ;;  %s675_s2 = inlined_call_operand.hbm [shape: bf16[32,128], index: 2, kind: input, shape index: {}]   ;;  %s676_s3 = inlined_call_operand.vmem [shape: f32[1,128], index: 3, kind: input, shape index: {}]   ;;  %s677_s4 = inlined_call_operand.hbm [shape: bf16[128,128], index: 4, kind: input, shape index: {}]   ;;  %s678_s5 = inlined_call_operand.vmem [shape: f32[1,128], index: 5, kind: input, shape index: {}]   ;;  %s679_s6 = inlined_call_operand.hbm [shape: bf16[128,128], index: 6, kind: input, shape index: {}]   ;;  %s680_s7 = inlined_call_operand.vmem [shape: f32[1,128], index: 7, kind: input, shape index: {}]   ;;  %s681_s8 = inlined_call_operand.hbm [shape: f32[8,128], index: 8, kind: output, shape index: {}]  }
   0x1   :  { %14 = vsyncpa [#allocation6], 0 }
   0x2   :  { %15 = vsyncpa [#allocation9], 0  ;;  %s33_s29 = sshll.u32 %s674_s1, 4  ;;  %s34_s29 = int_to_ptr.hbm [resolvable:$true] %s33_s29 }
   0x3   :  { %16 = vsyncpa [#allocation4], 0  ;;  %s592_s30 = smov [#allocation5]   ;;  %s58_s12 = sshll.u32 %s677_s4, 4  ;;  %s59_s12 = int_to_ptr.hbm [resolvable:$true] %s58_s12 }
   0x4   :  { %s35_s9 = sshll.u32 %s592_s30, 4  ;;  %s593_s13 = smov [#allocation8]   ;;  %s36_s9 = int_to_ptr.vmem [resolvable:$true] %s35_s9 }
   0x5   :  { %38 = dma.hbm_to_vmem [thread:$0]  %s34_s29, 128, %s36_s9, [#allocation6]  }
   0x6   :  { %s60_s14 = sshll.u32 %s593_s13, 4  ;;  %s22_s17 = sshll.u32 %s673_s0, 4  ;;  %s61_s14 = int_to_ptr.vmem [resolvable:$true] %s60_s14  ;;  %s23_s17 = int_to_ptr.hbm [resolvable:$true] %s22_s17 }
   0x7   :  { %s594_s1 = smov 64   ;;  %s595_s18 = smov 4  }
   0x8   :  { %66 = dma.hbm_to_vmem [thread:$0]  %s59_s12, 1024, %s61_s14, [#allocation9], %s594_s1, %s594_s1, %s595_s18  }
   0x9   :  { %s43_s21 = sshll.u32 %s675_s2, 4  ;;  %s596_s22 = smov [#allocation2]   ;;  %s44_s21 = int_to_ptr.hbm [resolvable:$true] %s43_s21 }
   0xa   :  { %s24_s23 = sshll.u32 %s596_s22, 4  ;;  %s597_s4 = smov [#allocation7]   ;;  %s25_s23 = int_to_ptr.vmem [resolvable:$true] %s24_s23 }
   0xb   :  { %27 = dma.hbm_to_vmem [thread:$0]  %s23_s17, 128, %s25_s23, [#allocation3]  }
   0xc   :  { %s45_s24 = sshll.u32 %s597_s4, 4  ;;  %s73_s0 = sshll.u32 %s679_s6, 4  ;;  %s46_s24 = int_to_ptr.vmem [resolvable:$true] %s45_s24  ;;  %s74_s0 = int_to_ptr.hbm [resolvable:$true] %s73_s0 }
   0xd   :  { %51 = dma.hbm_to_vmem [thread:$0]  %s44_s21, 256, %s46_s24, [#allocation6], %s594_s1, %s594_s1, %s595_s18  }
   0xe   :  { %s598_s27 = smov [#allocation10]  }
   0xf   :  { %s75_s28 = sshll.u32 %s598_s27, 4  ;;  %s76_s28 = int_to_ptr.vmem [resolvable:$true] %s75_s28 }
  0x10   :  { %81 = dma.hbm_to_vmem [thread:$0]  %s74_s0, 1024, %s76_s28, [#allocation9], %s594_s1, %s594_s1, %s595_s18  }
  0x11   :  { %584 = dma.done.wait [#allocation3], 128  }
  0x12   :  { %585 = vsyncadd [#allocation3], 4294967168 }
  0x13   :  { %586 = dma.done.wait [#allocation6], 384  }
  0x14   :  { %587 = vsyncadd [#allocation6], 4294966912 }
  0x15   :  { %588 = dma.done.wait [#allocation9], 2048  }
  0x16   :  { %589 = vsyncadd [#allocation9], 4294965248  ;;  %v411_v0 = vld [vmem:[#allocation7 + $0x8] sm:$0xff]  ;;  %v410_v2 = vld [vmem:[#allocation7] sm:$0xff]  ;;  %vm127_vm0 = vcmask 261120   ;;  %v599_v28 = vmov 0.0  }
  0x17   :  { %v419_v1 = vld [vmem:[#allocation8 + $0x38] sm:$0xff]  ;;  %137 = vmatpush.bf16.msra.mxu0 %v411_v0  ;;  %v105_v3 = vld [vmem:[#allocation2] sm:$0xff]  ;;  %v418_v4 = vld [vmem:[#allocation8 + $0x30] sm:$0xff]  ;;  %s600_s10 = smov [#allocation11]  }
  0x18   :  { %214 = vmatpush.bf16.msra.mxu1 %v419_v1  ;;  %v106_v5 = vpack.c.bf16 %v105_v3, %v105_v3  ;;  %v417_v6 = vld [vmem:[#allocation8 + $0x28] sm:$0xff]  ;;  %v416_v7 = vld [vmem:[#allocation8 + $0x20] sm:$0xff]  ;;  %v415_v8 = vld [vmem:[#allocation8 + $0x18] sm:$0xff]  ;;  %s322_s11 = sshll.u32 %s600_s10, 4  ;;  %s323_s11 = int_to_ptr.vmem [resolvable:$true] %s322_s11 }
  0x19   :  { %v414_v9 = vld [vmem:[#allocation8 + $0x10] sm:$0xff]  ;;  %v413_v10 = vld [vmem:[#allocation8 + $0x8] sm:$0xff]  ;;  %v412_v11 = vld [vmem:[#allocation8] sm:$0xff] }
  0x1a   :  { %v427_v12 = vld [vmem:[#allocation10 + $0x38] sm:$0xff]  ;;  %v426_v13 = vld [vmem:[#allocation10 + $0x30] sm:$0xff]  ;;  %v425_v14 = vld [vmem:[#allocation10 + $0x28] sm:$0xff] }
  0x1b   :  { %138 = vmatpush.bf16.msra.mxu0 %v410_v2  ;;  %303 = vmatpush.bf16.msra.mxu2 %v427_v12  ;;  %v424_v15 = vld [vmem:[#allocation10 + $0x20] sm:$0xff]  ;;  %v423_v16 = vld [vmem:[#allocation10 + $0x18] sm:$0xff]  ;;  %v422_v17 = vld [vmem:[#allocation10 + $0x10] sm:$0xff] }
  0x1c   :  { %215 = vmatpush.bf16.msra.mxu1 %v418_v4  ;;  %v437_v18 = vld [vmem:[%s676_s3] ss:$0 sm:$0xff]  ;;  %v421_v24 = vld [vmem:[#allocation10 + $0x8] sm:$0xff] }
  0x1d   :  { %v420_v25 = vld [vmem:[#allocation10] sm:$0xff]  ;;  %v228_v26 = vld [vmem:[#allocation5] sm:$0xff] }
  0x1e   :  { %344 = vmatmul.msk.bf16.vlgmr.msra.gmra.mxu0 %vm127_vm0, %v106_v5  ;;  %vm229_vm1 = vcmp.lt.f32.partialorder %v228_v26, 0.5  ;;  %v438_v27 = vld [vmem:[%s678_s5] ss:$0 sm:$0xff]  ;;  %s324_s5 = sshll.u32 %s681_s8, 4  ;;  %s325_s5 = int_to_ptr.hbm [resolvable:$true] %s324_s5 }
  0x1f   :  { %304 = vmatpush.bf16.msra.mxu2 %v426_v13  ;;  %v377_v29 = vsel %vm229_vm1, 1.0, %v599_v28  ;;  %v439_v37 = vld [vmem:[%s680_s7] ss:$0 sm:$0xff] }
  0x20   :  { %216 = vmatpush.bf16.msra.mxu1 %v417_v6  ;;  %v232_v32 = vmul.f32 2.0, %v377_v29 }
  0x23   :  { %305 = vmatpush.bf16.msra.mxu2 %v425_v14 }
  0x24   :  { %217 = vmatpush.bf16.msra.mxu1 %v416_v7 }
  0x27   :  { %306 = vmatpush.bf16.msra.mxu2 %v424_v15 }
  0x28   :  { %218 = vmatpush.bf16.msra.mxu1 %v415_v8 }
  0x2b   :  { %307 = vmatpush.bf16.msra.mxu2 %v423_v16 }
  0x2c   :  { %219 = vmatpush.bf16.msra.mxu1 %v414_v9 }
  0x2f   :  { %308 = vmatpush.bf16.msra.mxu2 %v422_v17 }
  0x30   :  { %220 = vmatpush.bf16.msra.mxu1 %v413_v10 }
  0x33   :  { %309 = vmatpush.bf16.msra.mxu2 %v421_v24 }
  0x34   :  { %221 = vmatpush.bf16.msra.mxu1 %v412_v11 }
  0x37   :  { %310 = vmatpush.bf16.msra.mxu2 %v420_v25 }
  0x9b   :  { %v140_v19 = vpop.f32.mrf.mxu0 }
  0x9c   :  { %v141_v20 = vadd.f32 %v437_v18, %v140_v19 }
  0x9e   :  { %v144_v21 = vmax.f32 %v141_v20, 0.0 }
  0xa0   :  { %v145_v22 = vpack.c.bf16 %v144_v21, %v144_v21 }
  0xa2   :  { %222 = vmatmul.bf16.vlgmr.msra.gmra.mxu1 %v145_v22 }
  0xa3   :  { %v142_v23 = vpop.f32.mrf.mxu0 }
 0x11f   :  { %v223_v30 = vpop.f32.mrf.mxu1 }
 0x120   :  { %v224_v31 = vadd.f32 %v438_v27, %v223_v30 }
 0x122   :  { %v227_v33 = vmax.f32 %v224_v31, 0.0 }
 0x124   :  { %v233_v34 = vmul.f32 %v232_v32, %v227_v33 }
 0x126   :  { %v234_v35 = vpack.c.bf16 %v233_v34, %v233_v34 }
 0x127   :  { %v225_v36 = vpop.f32.mrf.mxu1 }
 0x128   :  { %311 = vmatmul.bf16.vlgmr.msra.gmra.mxu2 %v234_v35 }
 0x1ab   :  { %v312_v38 = vpop.f32.mrf.mxu2 }
 0x1ac   :  { %v313_v39 = vadd.f32 %v439_v37, %v312_v38 }
 0x1ae   :  { %316 = vst [vmem:[#allocation11] sm:$0xff] %v313_v39 }
 0x1af   :  { %327 = dma.vmem_to_hbm [thread:$0]  %s323_s11, 128, %s325_s5, [#allocation4]  }
 0x1b3   :  { %v314_v40 = vpop.f32.mrf.mxu2 }
 0x1b4   :  { %590 = dma.done.wait [#allocation4], 128  }
 0x1b5   :  { %591 = vsyncadd [#allocation4], 4294967168 }
 0x1b6   :  { %332 = vsyncpa [#allocation3], 1 }
 0x1b7   :  { %333 = vsyncpa [#allocation6], 1 }
 0x1b8   :  { %334 = vsyncpa [#allocation9], 1 }
 0x1b9   :  { %335 = vsyncpa [#allocation4], 1 }

</bundles_post_ra>
